<compile_context>
chip_gen: v7x
topology: tpu7x:2x2x1
jax: 0.10.0
libtpu: 0.0.40
codegen_flags: <defaults>
</compile_context>

<pallas_src>
import math
import functools

import jax
import jax.numpy as jnp
from jax import lax
from jax.experimental import pallas as pl
from jax.experimental.pallas import tpu as pltpu

MAX_CORE_SPLITS = 2  # lets both v7x TensorCores participate; harmless on 1-TC chips


# ---------------------------------------------------------------------------
# Pallas kernel: sum over a (n_rows, n_cols) tensor of
#   KL( N(mu, exp(ls)) || N(prior_mu, exp(prior_log_sigma)) )
# ---------------------------------------------------------------------------
def _kl_sum_kernel(mu_ref, ls_ref, out_ref, acc_ref, *,
                   n_rows, block_rows, inner_blocks, needs_mask,
                   prior_mu, prior_log_sigma):
    c = pl.program_id(0)   # core-split axis ("parallel")
    i = pl.program_id(1)   # streaming/reduction axis ("arbitrary")

    @pl.when(i == 0)
    def _init():
        acc_ref[...] = jnp.zeros_like(acc_ref)

    mu = mu_ref[...].astype(jnp.float32)
    ls = ls_ref[...].astype(jnp.float32)

    # kl = ls1 - ls0 + (exp(ls0)^2 + (mu0 - mu1)^2) / (2*exp(ls1)^2) - 0.5
    denom_inv = 1.0 / (2.0 * math.exp(prior_log_sigma) ** 2)
    kl = ((prior_log_sigma - 0.5) - ls
          + (jnp.exp(2.0 * ls) + (mu - prior_mu) ** 2) * denom_inv)

    if needs_mask:
        # Mask rows outside the real tensor: the ragged tail block and phantom
        # blocks assigned to the second core split when work doesn't divide.
        row_start = (c * inner_blocks + i) * block_rows
        local_row = lax.broadcasted_iota(jnp.int32, kl.shape, 0)
        kl = jnp.where(local_row < (n_rows - row_start), kl, 0.0)

    # Block-shaped accumulation: pure VPU adds, no per-step cross-lane reduce.
    acc_ref[...] += kl

    @pl.when(i == pl.num_programs(1) - 1)
    def _finalize():
        out_ref[...] = jnp.sum(acc_ref[...]).reshape(1, 1)


def _kl_sum_jax(mu, log_sigma, prior_mu, prior_log_sigma):
    """Plain-JAX KL sum (used for tiny tensors, e.g. biases)."""
    mu = mu.astype(jnp.float32).reshape(-1)
    ls = log_sigma.astype(jnp.float32).reshape(-1)
    denom_inv = 1.0 / (2.0 * math.exp(prior_log_sigma) ** 2)
    kl = ((prior_log_sigma - 0.5) - ls
          + (jnp.exp(2.0 * ls) + (mu - prior_mu) ** 2) * denom_inv)
    return jnp.sum(kl)


def kl_sum_weight_pallas(mu, log_sigma, prior_mu, prior_log_sigma,
                         target_block_bytes=1 << 20):
    """Scalar KL sum for a 2-D parameter tensor via Pallas."""
    assert mu.ndim == 2 and mu.shape == log_sigma.shape
    n_rows, n_cols = mu.shape

    rows8 = (n_rows // 8) * 8
    if rows8 == 0:
        # Fewer than 8 rows: not worth (or shaped for) a kernel launch.
        return _kl_sum_jax(mu, log_sigma, prior_mu, prior_log_sigma)

    # ~1 MiB of f32 per input block (>= (512,128) -> near HBM roofline),
    # never larger than the tensor itself; rows kept a multiple of 8.
    bytes_per_row = n_cols * 4
    budget_rows = max(8, ((target_block_bytes // bytes_per_row) // 8) * 8)
    block_rows = int(min(rows8, budget_rows))

    num_blocks = pl.cdiv(n_rows, block_rows)
    # Only enable the core split when there is more than one block so tiny
    # tensors don't pay for a phantom (fully masked) second-core block.
    core_splits = min(MAX_CORE_SPLITS, num_blocks)
    inner_blocks = pl.cdiv(num_blocks, core_splits)

    # Mask only needed when the tiling doesn't divide the rows evenly or the
    # split leaves a phantom block on the second core.
    needs_mask = (num_blocks * block_rows != n_rows) or \
                 (inner_blocks * core_splits != num_blocks)

    def in_map(c, i):
        # Clamp so phantom blocks (second core, uneven split) stay in-bounds;
        # they are fully masked inside the kernel.
        return (jnp.minimum(c * inner_blocks + i, num_blocks - 1), 0)

    kernel = functools.partial(
        _kl_sum_kernel,
        n_rows=n_rows, block_rows=block_rows, inner_blocks=inner_blocks,
        needs_mask=needs_mask,
        prior_mu=float(prior_mu), prior_log_sigma=float(prior_log_sigma))

    partials = pl.pallas_call(
        kernel,
        out_shape=jax.ShapeDtypeStruct((core_splits, 1), jnp.float32),
        grid_spec=pltpu.PrefetchScalarGridSpec(
            num_scalar_prefetch=0,
            grid=(core_splits, inner_blocks),
            in_specs=[
                pl.BlockSpec((block_rows, n_cols), in_map),
                pl.BlockSpec((block_rows, n_cols), in_map),
            ],
            out_specs=pl.BlockSpec((1, 1), lambda c, i: (c, 0)),
            scratch_shapes=[pltpu.VMEM((block_rows, n_cols), jnp.float32)],
        ),
        compiler_params=pltpu.CompilerParams(
            dimension_semantics=("parallel", "arbitrary")),
    )(mu, log_sigma)
    return jnp.sum(partials)


# ---------------------------------------------------------------------------
# Minimal JAX "BayesLinear" parameter container (deterministic init)
# ---------------------------------------------------------------------------
class BayesLinearParams:
    def __init__(self, key, prior_mu, prior_sigma, in_features, out_features, bias=True):
        self.prior_mu = float(prior_mu)
        self.prior_sigma = float(prior_sigma)
        self.prior_log_sigma = math.log(prior_sigma)
        self.in_features = in_features
        self.out_features = out_features
        self.bias = bool(bias)

        stdv = 1.0 / math.sqrt(in_features)
        kw, kb = jax.random.split(key)
        self.weight_mu = jax.random.uniform(
            kw, (out_features, in_features), jnp.float32, minval=-stdv, maxval=stdv)
        self.weight_log_sigma = jnp.full(
            (out_features, in_features), self.prior_log_sigma, jnp.float32)
        if self.bias:
            self.bias_mu = jax.random.uniform(
                kb, (out_features,), jnp.float32, minval=-stdv, maxval=stdv)
            self.bias_log_sigma = jnp.full(
                (out_features,), self.prior_log_sigma, jnp.float32)
        else:
            self.bias_mu = None
            self.bias_log_sigma = None


# ---------------------------------------------------------------------------
# BKLLoss forward (mirrors bayesian_kl_loss)
# ---------------------------------------------------------------------------
def bkl_loss(layers, reduction="mean", last_layer_only=False):
    kl = jnp.float32(0.0)
    kl_sum = jnp.float32(0.0)
    n = 0
    for m in layers:
        if isinstance(m, BayesLinearParams):
            kl = kl_sum_weight_pallas(m.weight_mu, m.weight_log_sigma,
                                      m.prior_mu, m.prior_log_sigma)
            kl_sum = kl_sum + kl
            n += m.weight_mu.size
            if m.bias:
                # Tiny (out_features,) vectors: a dedicated pallas_call would
                # be pure launch overhead, so compute in plain JAX.
                kl = _kl_sum_jax(m.bias_mu, m.bias_log_sigma,
                                 m.prior_mu, m.prior_log_sigma)
                kl_sum = kl_sum + kl
                n += m.bias_mu.size
    if last_layer_only or n == 0:
        return kl
    if reduction == "mean":
        return kl_sum / n
    elif reduction == "sum":
        return kl_sum
    else:
        raise ValueError(reduction + " is not valid")


# ---------------------------------------------------------------------------
# Pure-JAX reference (same formula as the PyTorch module) for sanity checking.
# ---------------------------------------------------------------------------
def _kl_ref(mu0, ls0, mu1, ls1):
    return jnp.sum(ls1 - ls0 + (jnp.exp(ls0) ** 2 + (mu0 - mu1) ** 2)
                   / (2.0 * math.exp(ls1) ** 2) - 0.5)


def bkl_loss_ref(layers, reduction="mean"):
    kl_sum = jnp.float32(0.0)
    n = 0
    for m in layers:
        kl_sum += _kl_ref(m.weight_mu, m.weight_log_sigma, m.prior_mu, m.prior_log_sigma)
        n += m.weight_mu.size
        if m.bias:
            kl_sum += _kl_ref(m.bias_mu, m.bias_log_sigma, m.prior_mu, m.prior_log_sigma)
            n += m.bias_mu.size
    return kl_sum / n if reduction == "mean" else kl_sum


if __name__ == "__main__":
    key = jax.random.PRNGKey(0)
    k1, k2, k3, k4, k5 = jax.random.split(key, 5)

    # Small Bayesian MLP: 32 -> 32 -> 20 -> 16, prior N(0, 0.1).
    # The 20-row layer exercises the ragged-tail row mask.
    layers = [
        BayesLinearParams(k1, prior_mu=0.0, prior_sigma=0.1,
                          in_features=32, out_features=32, bias=True),
        BayesLinearParams(k2, prior_mu=0.0, prior_sigma=0.1,
                          in_features=32, out_features=20, bias=True),
        BayesLinearParams(k3, prior_mu=0.0, prior_sigma=0.1,
                          in_features=20, out_features=16, bias=True),
    ]

    loss = jax.block_until_ready(bkl_loss(layers, reduction="mean"))
    ref = jax.block_until_ready(bkl_loss_ref(layers, reduction="mean"))
    assert abs(float(loss) - float(ref)) < 5e-5, (float(loss), float(ref))

    loss_sum = jax.block_until_ready(bkl_loss(layers, reduction="sum"))
    ref_sum = jax.block_until_ready(bkl_loss_ref(layers, reduction="sum"))
    assert abs(float(loss_sum) - float(ref_sum)) < 1e-3 * max(1.0, abs(float(ref_sum))), (
        float(loss_sum), float(ref_sum))

    # Extra check 1: multi-block grid with an odd block count so the 2-way
    # core split, index clamping and partial-tail masking are exercised.
    mu = jax.random.uniform(k4, (100, 48), jnp.float32, minval=-0.2, maxval=0.2)
    ls = jnp.full((100, 48), math.log(0.1), jnp.float32)
    got = jax.block_until_ready(
        kl_sum_weight_pallas(mu, ls, 0.0, math.log(0.1), target_block_bytes=4096))
    want = jax.block_until_ready(_kl_sum_jax(mu, ls, 0.0, math.log(0.1)))
    assert abs(float(got) - float(want)) < 1e-3 * max(1.0, abs(float(want))), (
        float(got), float(want))

    # Extra check 2: evenly-divisible tiling (64x128, 16-row blocks, 4 blocks,
    # 2-way split) so the statically mask-free fast path is exercised.
    mu2 = jax.random.uniform(k5, (64, 128), jnp.float32, minval=-0.2, maxval=0.2)
    ls2 = jnp.full((64, 128), math.log(0.1), jnp.float32)
    got2 = jax.block_until_ready(
        kl_sum_weight_pallas(mu2, ls2, 0.0, math.log(0.1), target_block_bytes=8192))
    want2 = jax.block_until_ready(_kl_sum_jax(mu2, ls2, 0.0, math.log(0.1)))
    assert abs(float(got2) - float(want2)) < 1e-3 * max(1.0, abs(float(want2))), (
        float(got2), float(want2))

    print("KERNEL_OK")
</pallas_src>

<mosaic_0001>
module attributes {stable_mosaic.version = 11 : i64} {
  func.func @_kl_sum_kernel(%arg0: i32, %arg1: i32, %arg2: memref<32x32xf32, #tpu.memory_space<vmem>>, %arg3: memref<32x32xf32, #tpu.memory_space<vmem>>, %arg4: memref<1x1xf32, #tpu.memory_space<vmem>>, %arg5: memref<32x32xf32, #tpu.memory_space<vmem>>) attributes {dimension_semantics = [#tpu.dimension_semantics<parallel>, #tpu.dimension_semantics<arbitrary>], iteration_bounds = array<i64: 1, 1>, scalar_prefetch = 0 : i64, scratch_operands = 1 : i64, tpu.core_type = #tpu.core_type<tc>, window_params = [{transform_indices = @transform_0, window_bounds = array<i64: 32, 32>}, {transform_indices = @transform_1, window_bounds = array<i64: 32, 32>}, {transform_indices = @transform_2, window_bounds = array<i64: 1, 1>}]} {
    %c0_i32 = arith.constant 0 : i32
    %0 = arith.cmpi eq, %arg1, %c0_i32 : i32
    %1 = arith.extui %0 : i1 to i32
    %c0_i32_0 = arith.constant 0 : i32
    %2 = arith.cmpi ne, %1, %c0_i32_0 : i32
    scf.if %2 {
      %cst_13 = arith.constant 0.000000e+00 : f32
      %23 = vector.broadcast %cst_13 : f32 to vector<32x32xf32>
      %c0_14 = arith.constant 0 : index
      %c0_15 = arith.constant 0 : index
      %24 = vector.load %arg5[%c0_14, %c0_15] : memref<32x32xf32, #tpu.memory_space<vmem>>, vector<32x32xf32>
      tpu.vector_store %arg5[%c0_14, %c0_15], %23 {strides = array<i32>} : memref<32x32xf32, #tpu.memory_space<vmem>>, vector<32x32xf32>,
    } else {
    }
    %c0 = arith.constant 0 : index
    %c0_1 = arith.constant 0 : index
    %3 = vector.load %arg2[%c0, %c0_1] : memref<32x32xf32, #tpu.memory_space<vmem>>, vector<32x32xf32>
    %c0_2 = arith.constant 0 : index
    %c0_3 = arith.constant 0 : index
    %4 = vector.load %arg3[%c0_2, %c0_3] : memref<32x32xf32, #tpu.memory_space<vmem>>, vector<32x32xf32>
    %cst = arith.constant -2.80258512 : f32
    %5 = vector.broadcast %cst : f32 to vector<32x32xf32>
    %6 = arith.subf %5, %4 : vector<32x32xf32>
    %cst_4 = arith.constant 2.000000e+00 : f32
    %7 = vector.broadcast %cst_4 : f32 to vector<32x32xf32>
    %8 = arith.mulf %7, %4 : vector<32x32xf32>
    %9 = math.exp %8 : vector<32x32xf32>
    %cst_5 = arith.constant 0.000000e+00 : f32
    %10 = vector.broadcast %cst_5 : f32 to vector<32x32xf32>
    %11 = arith.subf %3, %10 : vector<32x32xf32>
    %12 = arith.mulf %11, %11 : vector<32x32xf32>
    %13 = arith.addf %9, %12 : vector<32x32xf32>
    %cst_6 = arith.constant 5.000000e+01 : f32
    %14 = vector.broadcast %cst_6 : f32 to vector<32x32xf32>
    %15 = arith.mulf %13, %14 : vector<32x32xf32>
    %16 = arith.addf %6, %15 : vector<32x32xf32>
    %c0_7 = arith.constant 0 : index
    %c0_8 = arith.constant 0 : index
    %17 = vector.load %arg5[%c0_7, %c0_8] : memref<32x32xf32, #tpu.memory_space<vmem>>, vector<32x32xf32>
    %18 = arith.addf %17, %16 : vector<32x32xf32>
    %c0_9 = arith.constant 0 : index
    %c0_10 = arith.constant 0 : index
    %19 = vector.load %arg5[%c0_9, %c0_10] : memref<32x32xf32, #tpu.memory_space<vmem>>, vector<32x32xf32>
    tpu.vector_store %arg5[%c0_9, %c0_10], %18 {strides = array<i32>} : memref<32x32xf32, #tpu.memory_space<vmem>>, vector<32x32xf32>,
    %c0_i32_11 = arith.constant 0 : i32
    %20 = arith.cmpi eq, %arg1, %c0_i32_11 : i32
    %21 = arith.extui %20 : i1 to i32
    %c0_i32_12 = arith.constant 0 : i32
    %22 = arith.cmpi ne, %21, %c0_i32_12 : i32
    scf.if %22 {
      %c0_13 = arith.constant 0 : index
      %c0_14 = arith.constant 0 : index
      %23 = vector.load %arg5[%c0_13, %c0_14] : memref<32x32xf32, #tpu.memory_space<vmem>>, vector<32x32xf32>
      %24 = vector.shape_cast %23 : vector<32x32xf32> to vector<1x32x32xf32>
      %cst_15 = arith.constant dense<0.000000e+00> : vector<1xf32>
      %25 = vector.multi_reduction <add>, %24, %cst_15 [1, 2] : vector<1x32x32xf32> to vector<1xf32>
      %26 = vector.shape_cast %25 : vector<1xf32> to vector<1x1x1xf32>
      %27 = vector.extract %26[0, 0, 0] : f32 from vector<1x1x1xf32>
      %28 = vector.broadcast %27 : f32 to vector<1x1xf32>
      %c0_16 = arith.constant 0 : index
      %c0_17 = arith.constant 0 : index
      %29 = vector.load %arg4[%c0_16, %c0_17] : memref<1x1xf32, #tpu.memory_space<vmem>>, vector<1x1xf32>
      tpu.vector_store %arg4[%c0_16, %c0_17], %28 {strides = array<i32>} : memref<1x1xf32, #tpu.memory_space<vmem>>, vector<1x1xf32>,
    } else {
    }
    return
  }
  func.func @transform_0(%arg0: i32, %arg1: i32) -> (i32, i32) {
    %c1_i32 = arith.constant 1 : i32
    %0 = arith.muli %arg0, %c1_i32 : i32
    %1 = arith.addi %0, %arg1 : i32
    %c0_i32 = arith.constant 0 : i32
    %2 = arith.minsi %1, %c0_i32 : i32
    %c0_i32_0 = arith.constant 0 : i32
    %c0_i32_1 = arith.constant 0 : i32
    return %2, %c0_i32_0 : i32, i32
  }
  func.func @transform_1(%arg0: i32, %arg1: i32) -> (i32, i32) {
    %c1_i32 = arith.constant 1 : i32
    %0 = arith.muli %arg0, %c1_i32 : i32
    %1 = arith.addi %0, %arg1 : i32
    %c0_i32 = arith.constant 0 : i32
    %2 = arith.minsi %1, %c0_i32 : i32
    %c0_i32_0 = arith.constant 0 : i32
    %c0_i32_1 = arith.constant 0 : i32
    return %2, %c0_i32_0 : i32, i32
  }
  func.func @transform_2(%arg0: i32, %arg1: i32) -> (i32, i32) {
    %c0_i32 = arith.constant 0 : i32
    %c0_i32_0 = arith.constant 0 : i32
    return %arg0, %c0_i32 : i32, i32
  }
}

</mosaic_0001>

<bundles_post_ra>
// kernel: tpu_custom_call.1
= control target key start
LH: loop header
LB: loop body
LE: loop exit
PB: predicated region body
PF: predicated region fallthrough
CT: control target
= control target key end

     0   :  { %7 = vsyncpa [#allocation4], 0  ;;  %s325_s0 = inlined_call_operand.hbm [shape: f32[32,32], index: 0, kind: input, shape index: {}]   ;;  %s326_s1 = inlined_call_operand.hbm [shape: f32[32,32], index: 1, kind: input, shape index: {}]   ;;  %s327_s2 = inlined_call_operand.hbm [shape: f32[1,1], index: 2, kind: output, shape index: {}]  }
   0x1   :  { %8 = vsyncpa [#allocation7], 0 }
   0x2   :  { %9 = vsyncpa [#allocation5], 0  ;;  %s256_s9 = smov [#allocation3]   ;;  %s184_s13 = scalar_lea.hbm %s325_s0, 512 }
   0x3   :  { %s21_s10 = sshll.u32 %s256_s9, 4  ;;  %p185_p0 = scmp.ne.s32.totalorder %s325_s0, %s184_s13  ;;  %s22_s10 = int_to_ptr.vmem [resolvable:$true] %s21_s10 }
   0x4   :  { %p188_p1 = scmp.lt.u32.totalorder %s184_s13, %s325_s0 }
   0x6   :  { %p190_p2 = pnand %p188_p1, %p185_p0 }
   0x8   :  { %193 = shalt.err (!%p190_p2)
}
   0x9   :  { %s194_s18 = scalar_lea.vmem %s22_s10, 512  ;;  %p199_p4 = scmp.lt.s32.totalorder %s22_s10, %s22_s10 }
   0xa   :  { %p195_p3 = scmp.ne.s32.totalorder %s22_s10, %s194_s18  ;;  %p200_p5 = scmp.lt.s32.totalorder %s194_s18, %s194_s18 }
   0xc   :  { %p201_p6 = por %p200_p5, %p199_p4 }
   0xe   :  { %p202_p7 = pnand %p201_p6, %p195_p3 }
  0x10   :  { %205 = shalt.err (!%p202_p7)
}
  0x11   :  { %s257_s19 = smov 128   ;;  %s258_s20 = smov 8  }
  0x12   :  { %27 = dma.hbm_to_vmem [thread:$0]  %s325_s0, 512, %s22_s10, [#allocation4], %s257_s19, %s257_s19, %s258_s20  }
  0x13   :  { %s259_s23 = smov [#allocation6]   ;;  %s206_s27 = scalar_lea.hbm %s326_s1, 512 }
  0x14   :  { %s39_s24 = sshll.u32 %s259_s23, 4  ;;  %p207_p8 = scmp.ne.s32.totalorder %s326_s1, %s206_s27  ;;  %s40_s24 = int_to_ptr.vmem [resolvable:$true] %s39_s24 }
  0x15   :  { %p210_p9 = scmp.lt.u32.totalorder %s206_s27, %s326_s1 }
  0x17   :  { %p212_p10 = pnand %p210_p9, %p207_p8 }
  0x19   :  { %215 = shalt.err (!%p212_p10)
}
  0x1a   :  { %s216_s4 = scalar_lea.vmem %s40_s24, 512  ;;  %p221_p12 = scmp.lt.s32.totalorder %s40_s24, %s40_s24 }
  0x1b   :  { %p217_p11 = scmp.ne.s32.totalorder %s40_s24, %s216_s4  ;;  %p222_p13 = scmp.lt.s32.totalorder %s216_s4, %s216_s4 }
  0x1d   :  { %p223_p0 = por %p222_p13, %p221_p12 }
  0x1f   :  { %p224_p1 = pnand %p223_p0, %p217_p11 }
  0x21   :  { %227 = shalt.err (!%p224_p1)
}
  0x22   :  { %45 = dma.hbm_to_vmem [thread:$0]  %s326_s1, 512, %s40_s24, [#allocation7], %s257_s19, %s257_s19, %s258_s20  }
  0x23   :  { %250 = dma.done.wait [#allocation4], 512  }
  0x24   :  { %251 = vsyncadd [#allocation4], 4294966784 }
  0x25   :  { %252 = dma.done.wait [#allocation7], 512  }
  0x26   :  { %253 = vsyncadd [#allocation7], 4294966784  ;;  %vm64_vm0 = vcmask 261120   ;;  %v260_v0 = vmov 0.0   ;;  %v73_v1 = vld [vmem:[#allocation6] sm:$0xff]  ;;  %v74_v2 = vld [vmem:[#allocation6 + $0x8] sm:$0xff] }
  0x27   :  { %65 = vst.msk [vmem:[#allocation2] sm:$0xff] %vm64_vm0, %v260_v0  ;;  %66 = vst.msk [vmem:[#allocation2 + $0x8] sm:$0xff] %vm64_vm0, %v260_v0  ;;  %v75_v3 = vld [vmem:[#allocation6 + $0x10] sm:$0xff]  ;;  %v76_v4 = vld [vmem:[#allocation6 + $0x18] sm:$0xff]  ;;  %v81_v5 = vmul.f32 2.0, %v73_v1  ;;  %v82_v6 = vmul.f32 2.0, %v74_v2 }
  0x28   :  { %67 = vst.msk [vmem:[#allocation2 + $0x10] sm:$0xff] %vm64_vm0, %v260_v0  ;;  %68 = vst.msk [vmem:[#allocation2 + $0x18] sm:$0xff] %vm64_vm0, %v260_v0  ;;  %v83_v7 = vmul.f32 2.0, %v75_v3  ;;  %v84_v8 = vmul.f32 2.0, %v76_v4  ;;  %v69_v13 = vld [vmem:[#allocation3] sm:$0xff]  ;;  %v70_v14 = vld [vmem:[#allocation3 + $0x8] sm:$0xff] }
  0x29   :  { %v85_v9 = vmul.f32 1.442695, %v81_v5  ;;  %v87_v10 = vmul.f32 1.442695, %v82_v6  ;;  %v71_v15 = vld [vmem:[#allocation3 + $0x10] sm:$0xff]  ;;  %v72_v16 = vld [vmem:[#allocation3 + $0x18] sm:$0xff]  ;;  %v93_v17 = vmul.f32 %v69_v13, %v69_v13  ;;  %v94_v18 = vmul.f32 %v70_v14, %v70_v14 }
  0x2a   :  { %v89_v11 = vmul.f32 1.442695, %v83_v7  ;;  %v91_v12 = vmul.f32 1.442695, %v84_v8  ;;  %v95_v19 = vmul.f32 %v71_v15, %v71_v15  ;;  %v96_v21 = vmul.f32 %v72_v16, %v72_v16  ;;  %s261_s1 = smov [#allocation8]  }
  0x2b   :  { %176 = vpow2.f32 %v85_v9  ;;  %v77_v23 = vsub.f32 -2.8025851, %v73_v1  ;;  %v78_v26 = vsub.f32 -2.8025851, %v74_v2  ;;  %v79_v29 = vsub.f32 -2.8025851, %v75_v3 }
  0x2c   :  { %178 = vpow2.f32 %v87_v10  ;;  %v80_v32 = vsub.f32 -2.8025851, %v76_v4  ;;  %s154_s6 = sshll.u32 %s261_s1, 4  ;;  %vm146_vm1 = vcmask 0   ;;  %s155_s6 = int_to_ptr.vmem [resolvable:$true] %s154_s6 }
  0x2d   :  { %180 = vpow2.f32 %v89_v11  ;;  %s228_s8 = scalar_lea.vmem %s155_s6, 16  ;;  %s232_s9 = scalar_lea.vmem %s155_s6, 32 }
  0x2e   :  { %182 = vpow2.f32 %v91_v12  ;;  %v109_v35 = vld [vmem:[#allocation2] sm:$0xff]  ;;  %v110_v38 = vld [vmem:[#allocation2 + $0x8] sm:$0xff]  ;;  %p229_p2 = scmp.ne.s32.totalorder %s155_s6, %s228_s8  ;;  %p233_p3 = scmp.lt.s32.totalorder %s155_s6, %s155_s6 }
  0x2f   :  { %v111_v41 = vld [vmem:[#allocation2 + $0x10] sm:$0xff]  ;;  %v112_v43 = vld [vmem:[#allocation2 + $0x18] sm:$0xff]  ;;  %p234_p4 = scmp.lt.s32.totalorder %s232_s9, %s228_s8 }
  0x31   :  { %p235_p5 = por %p234_p4, %p233_p3 }
  0x33   :  { %p236_p6 = pnand %p235_p5, %p229_p2 }
  0x35   :  { %v177_v20 = vpop.eup %176 }
  0x36   :  { %v179_v22 = vpop.eup %178  ;;  %v97_v24 = vadd.f32 %v177_v20, %v93_v17 }
  0x37   :  { %v181_v25 = vpop.eup %180  ;;  %v98_v27 = vadd.f32 %v179_v22, %v94_v18 }
  0x38   :  { %v183_v28 = vpop.eup %182  ;;  %v99_v30 = vadd.f32 %v181_v25, %v95_v19  ;;  %v101_v31 = vmul.f32 50.0, %v97_v24 }
  0x39   :  { %v100_v33 = vadd.f32 %v183_v28, %v96_v21  ;;  %v102_v34 = vmul.f32 50.0, %v98_v27 }
  0x3a   :  { %v103_v36 = vmul.f32 50.0, %v99_v30  ;;  %v105_v37 = vadd.f32 %v101_v31, %v77_v23 }
  0x3b   :  { %v104_v39 = vmul.f32 50.0, %v100_v33  ;;  %v106_v40 = vadd.f32 %v102_v34, %v78_v26 }
  0x3c   :  { %v107_v42 = vadd.f32 %v103_v36, %v79_v29  ;;  %v113_v44 = vadd.f32 %v109_v35, %v105_v37 }
  0x3d   :  { %v108_v45 = vadd.f32 %v104_v39, %v80_v32  ;;  %v114_v46 = vadd.f32 %v110_v38, %v106_v40 }
  0x3e   :  { %v115_v47 = vadd.f32 %v111_v41, %v107_v42  ;;  %118 = vst.msk [vmem:[#allocation2] sm:$0xff] %vm64_vm0, %v113_v44 }
  0x3f   :  { %v116_v48 = vadd.f32 %v112_v43, %v108_v45  ;;  %119 = vst.msk [vmem:[#allocation2 + $0x8] sm:$0xff] %vm64_vm0, %v114_v46 }
  0x40   :  { %120 = vst.msk [vmem:[#allocation2 + $0x10] sm:$0xff] %vm64_vm0, %v115_v47 }
  0x41   :  { %121 = vst.msk [vmem:[#allocation2 + $0x18] sm:$0xff] %vm64_vm0, %v116_v48 }
  0x45   :  { %v125_v49 = vld [vmem:[#allocation2] sm:$0xff] }
  0x46   :  { %v126_v50 = vld [vmem:[#allocation2 + $0x8] sm:$0xff]  ;;  %v129_v51 = vsel %vm64_vm0, %v125_v49, 0.0 }
  0x47   :  { %v127_v52 = vld [vmem:[#allocation2 + $0x10] sm:$0xff]  ;;  %v130_v53 = vsel %vm64_vm0, %v126_v50, 0.0 }
  0x48   :  { %v128_v54 = vld [vmem:[#allocation2 + $0x18] sm:$0xff]  ;;  %v131_v55 = vadd.f32 %v130_v53, %v129_v51  ;;  %v132_v56 = vsel %vm64_vm0, %v127_v52, 0.0 }
  0x49   :  { %v134_v57 = vsel %vm64_vm0, %v128_v54, 0.0 }
  0x4a   :  { %v133_v58 = vadd.f32 %v132_v56, %v131_v55 }
  0x4c   :  { %v135_v59 = vadd.f32 %v134_v57, %v133_v58 }
  0x4e   :  { %136 = vadd.xlane.f32.xlu0 %v135_v59 }
  0xdb   :  { %v137_v60 = vpop.xlane.xlu0 %136 }
  0xdc   :  { %v138_v61 = vrot.slane %v137_v60, 4 }
  0xde   :  { %v139_v62 = vadd.f32 %v138_v61, %v137_v60 }
  0xe0   :  { %v140_v63 = vrot.slane %v139_v62, 2 }
  0xe2   :  { %v141_v0 = vadd.f32 %v140_v63, %v139_v62 }
  0xe4   :  { %v142_v1 = vrot.slane %v141_v0, 1 }
  0xe6   :  { %v143_v2 = vadd.f32 %v142_v1, %v141_v0 }
  0xe8   :  { %168 = vpush %v143_v2 }
 0x119   :  { %s169_s7 = spop %168 }
 0x11a   :  { %v145_v3 = vstv %s169_s7 }
 0x11b   :  { %147 = vst.msk [vmem:[#allocation8] sm:$0x1] %vm146_vm1, %v145_v3 }
 0x11c   :  { %239 = shalt.err (!%p236_p6)
}
 0x11d   :  { %s240_s12 = scalar_lea.hbm %s327_s2, 16 }
 0x11e   :  { %p241_p7 = scmp.ne.s32.totalorder %s327_s2, %s240_s12  ;;  %p244_p8 = scmp.lt.u32.totalorder %s240_s12, %s327_s2 }
 0x120   :  { %p246_p9 = pnand %p244_p8, %p241_p7 }
 0x122   :  { %249 = shalt.err (!%p246_p9)
}
 0x123   :  { %157 = dma.vmem_to_hbm [thread:$0]  %s155_s6, 16, %s327_s2, [#allocation5]  }
 0x124   :  { %254 = dma.done.wait [#allocation5], 16  }
 0x125   :  { %255 = vsyncadd [#allocation5], 4294967280 }
 0x126   :  { %161 = vsyncpa [#allocation4], 1 }
 0x127   :  { %162 = vsyncpa [#allocation7], 1 }
 0x128   :  { %163 = vsyncpa [#allocation5], 1 }

</bundles_post_ra>
